<compile_context>
chip_gen: v5e
topology: v5e:2x2
jax: 0.10.0
libtpu: 0.0.40
codegen_flags: <defaults>
</compile_context>

<pallas_src>
import functools

import jax
import jax.numpy as jnp
from jax.experimental import pallas as pl
from jax.experimental.pallas import tpu as pltpu


GROUP = 4   # spatial positions packed per 128-lane row (4 * 32 = 128)
KPAD = 32   # 9*C = 27 patch taps padded to 32 lanes per position


# ----------------------------------------------------------------------------
# Fused Pallas kernel: Bt images per grid step
# ----------------------------------------------------------------------------
def _fused_frcnn_kernel(p_ref, wbb_ref, bbb_ref, wrpn_ref, brpn_ref,
                        wrpnh_ref, brpnh_ref, wfc_ref, bfc_ref,
                        wroi_ref, broi_ref,
                        feats_ref, rpn_ref, roi_ref):
    """Per grid step (Bt images):

    p_ref    : (Bt, HW/4, 128) bf16  im2col patches, 4 positions x 32 lanes
    wbb_ref  : (128, 128) bf16       block-diag 3x3 conv weight (1/std folded)
    bbb_ref  : (1, 128)   f32        conv bias (tiled per group position)
    wrpn_ref : (128, 128) bf16       block-diag RPN shared 1x1 conv
    wrpnh_ref: (128, 64)  bf16       block-diag RPN [cls|box] head (15->16 pad)
    wfc_ref  : (128, D)   bf16       ROI FC (tiled over groups, 1/HW folded)
    wroi_ref : (D, 32)    bf16       ROI [cls|box] head (25->32 pad)
    feats_ref: (Bt, HW/4, 128) bf16  backbone features (grouped, lane-dense)
    rpn_ref  : (Bt, HW/4, 64)  bf16  RPN outputs (grouped, 16 ch/position)
    roi_ref  : (Bt, 1, 32)     f32   ROI class logits | box regression
    """
    Bt, HWG, L = p_ref.shape
    M = Bt * HWG

    patches = p_ref[...].reshape(M, L)                       # layout no-op

    # ---- backbone: 3x3 'same' conv + ReLU as ONE MXU matmul (K = 128) ----
    feats = jnp.dot(patches, wbb_ref[...],
                    preferred_element_type=jnp.float32) + bbb_ref[...]
    feats = jnp.maximum(feats, 0.0)                          # (M, 128) f32
    feats_bf = feats.astype(jnp.bfloat16)
    feats_ref[...] = feats_bf.reshape(feats_ref.shape)       # dense 128-lane store

    # ---- RPN: shared 1x1 conv + ReLU, fused [objectness | box] head ----
    hid = jnp.dot(feats_bf, wrpn_ref[...],
                  preferred_element_type=jnp.float32) + brpn_ref[...]
    hid = jnp.maximum(hid, 0.0)
    rpn = jnp.dot(hid.astype(jnp.bfloat16), wrpnh_ref[...],
                  preferred_element_type=jnp.float32) + brpnh_ref[...]
    rpn_ref[...] = rpn.astype(rpn_ref.dtype).reshape(rpn_ref.shape)

    # ---- ROI heads on whole-image average pool, batched (M = Bt) ----
    # TODO(synk): proposal generation + ROIAlign are data-dependent box
    # selections with no clean static Pallas equivalent; a whole-image average
    # pool stands in as the pooled ROI feature per image.
    pooled = jnp.sum(feats.reshape(Bt, HWG, -1), axis=1)     # (Bt, 128) f32
    roi_hid = jnp.maximum(
        jnp.dot(pooled.astype(jnp.bfloat16), wfc_ref[...],
                preferred_element_type=jnp.float32) + bfc_ref[...], 0.0)
    roi = jnp.dot(roi_hid.astype(jnp.bfloat16), wroi_ref[...],
                  preferred_element_type=jnp.float32) + broi_ref[...]
    roi_ref[...] = roi.reshape(roi_ref.shape)


# ----------------------------------------------------------------------------
# Parameters
# ----------------------------------------------------------------------------
def make_params(key, in_ch=3, feat_ch=32, num_anchors=3, fc_dim=64, num_classes=5):
    ks = jax.random.split(key, 8)
    scale = 0.05
    return {
        "mean": jnp.array([[0.485, 0.456, 0.406]], dtype=jnp.float32),
        "std": jnp.array([[0.229, 0.224, 0.225]], dtype=jnp.float32),
        "bb_w": scale * jax.random.normal(ks[0], (9 * in_ch, feat_ch), jnp.float32),
        "bb_b": jnp.zeros((feat_ch,), jnp.float32),
        "rpn_w": scale * jax.random.normal(ks[1], (feat_ch, feat_ch), jnp.float32),
        "rpn_b": jnp.zeros((feat_ch,), jnp.float32),
        "rpn_cls_w": scale * jax.random.normal(ks[2], (feat_ch, num_anchors), jnp.float32),
        "rpn_cls_b": jnp.zeros((num_anchors,), jnp.float32),
        "rpn_box_w": scale * jax.random.normal(ks[3], (feat_ch, 4 * num_anchors), jnp.float32),
        "rpn_box_b": jnp.zeros((4 * num_anchors,), jnp.float32),
        "fc_w": scale * jax.random.normal(ks[4], (feat_ch, fc_dim), jnp.float32),
        "fc_b": jnp.zeros((fc_dim,), jnp.float32),
        "cls_w": scale * jax.random.normal(ks[5], (fc_dim, num_classes), jnp.float32),
        "cls_b": jnp.zeros((num_classes,), jnp.float32),
        "box_w": scale * jax.random.normal(ks[6], (fc_dim, 4 * num_classes), jnp.float32),
        "box_b": jnp.zeros((4 * num_classes,), jnp.float32),
    }


# ----------------------------------------------------------------------------
# Operand preparation: 1/std fold, block-diag grouping, padding, bf16 casts
# ----------------------------------------------------------------------------
def _prepare_operands(params, hw):
    mean = params["mean"].reshape(-1)                   # (C,)
    inv_std = (1.0 / params["std"]).reshape(-1)         # (C,)
    C = mean.shape[0]

    # Conv weight with 1/std folded in (mean is subtracted in the wrapper, so
    # the bias is unchanged and zero-padding of the shifted image is exact).
    wbb = params["bb_w"] * jnp.tile(inv_std, 9)[:, None]          # (9C, F)
    wbb = jnp.pad(wbb, ((0, KPAD - 9 * C), (0, 0)))               # (32, F)

    eye = jnp.eye(GROUP, dtype=jnp.float32)
    bd = lambda w: jnp.kron(eye, w)                               # block-diag x4
    tile_b = lambda b: jnp.tile(b, GROUP).reshape(1, -1)          # per-position bias

    n_rpn = params["rpn_cls_w"].shape[1] + params["rpn_box_w"].shape[1]   # 15
    rpn_pad = 16
    wrpnh = jnp.concatenate([params["rpn_cls_w"], params["rpn_box_w"]], axis=1)
    wrpnh = jnp.pad(wrpnh, ((0, 0), (0, rpn_pad - n_rpn)))
    brpnh = jnp.pad(jnp.concatenate([params["rpn_cls_b"], params["rpn_box_b"]]),
                    (0, rpn_pad - n_rpn))

    n_roi = params["cls_w"].shape[1] + params["box_w"].shape[1]           # 25
    roi_pad = 32
    wroi = jnp.concatenate([params["cls_w"], params["box_w"]], axis=1)
    wroi = jnp.pad(wroi, ((0, 0), (0, roi_pad - n_roi)))
    broi = jnp.pad(jnp.concatenate([params["cls_b"], params["box_b"]]),
                   (0, roi_pad - n_roi))

    return {
        "mean": mean,
        "wbb": bd(wbb).astype(jnp.bfloat16),                      # (128, 128)
        "bbb": tile_b(params["bb_b"]),                            # (1, 128) f32
        "wrpn": bd(params["rpn_w"]).astype(jnp.bfloat16),         # (128, 128)
        "brpn": tile_b(params["rpn_b"]),
        "wrpnh": bd(wrpnh).astype(jnp.bfloat16),                  # (128, 64)
        "brpnh": tile_b(brpnh),
        # 1/HW (mean-pool scale) and group un-grouping folded into the FC weight.
        "wfc": (jnp.tile(params["fc_w"], (GROUP, 1)) / hw).astype(jnp.bfloat16),
        "bfc": params["fc_b"].reshape(1, -1),
        "wroi": wroi.astype(jnp.bfloat16),                        # (D, 32)
        "broi": broi.reshape(1, -1),
        "rpn_pad": rpn_pad,
        "roi_pad": roi_pad,
    }


def _im2col_grouped(images_nchw, mean):
    """(N,C,H,W) raw -> (N, HW/4, 128) bf16 mean-subtracted, zero-padded patches."""
    N, C, H, W = images_nchw.shape
    x = jnp.transpose(images_nchw, (0, 2, 3, 1)).astype(jnp.float32)       # NHWC
    x = x - mean.reshape(1, 1, 1, C)                                       # mean fold
    xp = jnp.pad(x, ((0, 0), (1, 1), (1, 1), (0, 0)))                      # 'same' pad
    taps = [xp[:, dy:dy + H, dx:dx + W, :] for dy in range(3) for dx in range(3)]
    patches = jnp.concatenate(taps, axis=-1)                               # (N,H,W,9C)
    patches = jnp.pad(patches, ((0, 0), (0, 0), (0, 0), (0, KPAD - 9 * C)))
    HW = H * W
    patches = patches.reshape(N, HW // GROUP, GROUP * KPAD)                # (N,HW/4,128)
    return patches.astype(jnp.bfloat16)


# ----------------------------------------------------------------------------
# Forward
# ----------------------------------------------------------------------------
@jax.jit
def faster_rcnn_forward(params, images_nchw):
    N, C, H, W = images_nchw.shape
    HW = H * W
    assert HW % GROUP == 0, "H*W must be a multiple of the lane group (4)"

    ops = _prepare_operands(params, HW)
    patches = _im2col_grouped(images_nchw, ops["mean"])         # (N, HW/4, 128) bf16

    F = params["bb_w"].shape[1]
    num_anchors = params["rpn_cls_w"].shape[1]
    num_classes = params["cls_w"].shape[1]
    HWG = HW // GROUP
    L = GROUP * KPAD                      # 128 input lanes
    FL = GROUP * F                        # 128 feature lanes
    RL = GROUP * ops["rpn_pad"]           # 64 rpn lanes
    n_roi_p = ops["roi_pad"]              # 32

    # Batch blocking: Bt images per grid step (amortize per-step overhead,
    # give the ROI matmuls M=Bt); keep >=2 grid steps so megacore has work.
    Bt = 1 if N < 2 else min(8, max(1, N // 2))
    Npad = ((N + Bt - 1) // Bt) * Bt
    if Npad != N:
        patches = jnp.pad(patches, ((0, Npad - N), (0, 0), (0, 0)))

    def whole(arr):
        nd = arr.ndim
        return pl.BlockSpec(arr.shape, lambda b, _nd=nd: (0,) * _nd)

    feats_g, rpn_g, roi = pl.pallas_call(
        _fused_frcnn_kernel,
        out_shape=(
            jax.ShapeDtypeStruct((Npad, HWG, FL), jnp.bfloat16),
            jax.ShapeDtypeStruct((Npad, HWG, RL), jnp.bfloat16),
            jax.ShapeDtypeStruct((Npad, 1, n_roi_p), jnp.float32),
        ),
        grid=(Npad // Bt,),
        in_specs=[
            pl.BlockSpec((Bt, HWG, L), lambda b: (b, 0, 0)),
            whole(ops["wbb"]), whole(ops["bbb"]),
            whole(ops["wrpn"]), whole(ops["brpn"]),
            whole(ops["wrpnh"]), whole(ops["brpnh"]),
            whole(ops["wfc"]), whole(ops["bfc"]),
            whole(ops["wroi"]), whole(ops["broi"]),
        ],
        out_specs=(
            pl.BlockSpec((Bt, HWG, FL), lambda b: (b, 0, 0)),
            pl.BlockSpec((Bt, HWG, RL), lambda b: (b, 0, 0)),
            pl.BlockSpec((Bt, 1, n_roi_p), lambda b: (b, 0, 0)),
        ),
        compiler_params=pltpu.CompilerParams(
            dimension_semantics=("parallel",),       # shard batch blocks across TCs
            vmem_limit_bytes=32 * 1024 * 1024,       # portable (v7x-safe) budget
        ),
    )(patches, ops["wbb"], ops["bbb"], ops["wrpn"], ops["brpn"],
      ops["wrpnh"], ops["brpnh"], ops["wfc"], ops["bfc"],
      ops["wroi"], ops["broi"])

    # Ungroup lane-packed outputs (wrapper-side reshapes; padding sliced off).
    feats = feats_g[:N].reshape(N, HWG, GROUP, F).reshape(N, H, W, F)
    rpn = rpn_g[:N].reshape(N, HWG, GROUP, ops["rpn_pad"]).reshape(N, H, W, ops["rpn_pad"])
    rpn = rpn[..., :num_anchors + 4 * num_anchors]
    roi = roi[:N, 0, :num_classes + 4 * num_classes]

    return {
        "features": feats,                                   # bf16
        "rpn_objectness": rpn[..., :num_anchors],            # bf16
        "rpn_box_deltas": rpn[..., num_anchors:],            # bf16
        "class_logits": roi[:, :num_classes],                # f32
        "box_regression": roi[:, num_classes:],              # f32
    }


if __name__ == "__main__":
    key = jax.random.PRNGKey(0)
    k_img, k_par = jax.random.split(key)

    # Small deterministic input, NCHW like the PyTorch reference.
    images = jax.random.uniform(k_img, (2, 3, 16, 16), dtype=jnp.float32)
    params = make_params(k_par)

    out = faster_rcnn_forward(params, images)
    out = jax.tree_util.tree_map(jax.block_until_ready, out)

    # sanity checks on shapes / values
    assert out["features"].shape == (2, 16, 16, 32)
    assert out["rpn_objectness"].shape == (2, 16, 16, 3)
    assert out["rpn_box_deltas"].shape == (2, 16, 16, 12)
    assert out["class_logits"].shape == (2, 5)
    assert out["box_regression"].shape == (2, 20)
    for v in out.values():
        assert bool(jnp.all(jnp.isfinite(v.astype(jnp.float32))))

    print("KERNEL_OK")
</pallas_src>

<mosaic_0001>
module attributes {stable_mosaic.version = 11 : i64} {
  func.func @_fused_frcnn_kernel(%arg0: i32, %arg1: memref<1x64x128xbf16, #tpu.memory_space<vmem>>, %arg2: memref<128x128xbf16, #tpu.memory_space<vmem>>, %arg3: memref<1x128xf32, #tpu.memory_space<vmem>>, %arg4: memref<128x128xbf16, #tpu.memory_space<vmem>>, %arg5: memref<1x128xf32, #tpu.memory_space<vmem>>, %arg6: memref<128x64xbf16, #tpu.memory_space<vmem>>, %arg7: memref<1x64xf32, #tpu.memory_space<vmem>>, %arg8: memref<128x64xbf16, #tpu.memory_space<vmem>>, %arg9: memref<1x64xf32, #tpu.memory_space<vmem>>, %arg10: memref<64x32xbf16, #tpu.memory_space<vmem>>, %arg11: memref<1x32xf32, #tpu.memory_space<vmem>>, %arg12: memref<1x64x128xbf16, #tpu.memory_space<vmem>>, %arg13: memref<1x64x64xbf16, #tpu.memory_space<vmem>>, %arg14: memref<1x1x32xf32, #tpu.memory_space<vmem>>) attributes {dimension_semantics = [#tpu.dimension_semantics<parallel>], iteration_bounds = array<i64: 2>, scalar_prefetch = 0 : i64, scratch_operands = 0 : i64, tpu.core_type = #tpu.core_type<tc>, window_params = [{transform_indices = @transform_0, window_bounds = array<i64: 1, 64, 128>}, {pipeline_mode = #tpu.pipeline_mode<synchronous>, transform_indices = @transform_1, window_bounds = array<i64: 128, 128>}, {pipeline_mode = #tpu.pipeline_mode<synchronous>, transform_indices = @transform_2, window_bounds = array<i64: 1, 128>}, {pipeline_mode = #tpu.pipeline_mode<synchronous>, transform_indices = @transform_3, window_bounds = array<i64: 128, 128>}, {pipeline_mode = #tpu.pipeline_mode<synchronous>, transform_indices = @transform_4, window_bounds = array<i64: 1, 128>}, {pipeline_mode = #tpu.pipeline_mode<synchronous>, transform_indices = @transform_5, window_bounds = array<i64: 128, 64>}, {pipeline_mode = #tpu.pipeline_mode<synchronous>, transform_indices = @transform_6, window_bounds = array<i64: 1, 64>}, {pipeline_mode = #tpu.pipeline_mode<synchronous>, transform_indices = @transform_7, window_bounds = array<i64: 128, 64>}, {pipeline_mode = #tpu.pipeline_mode<synchronous>, transform_indices = @transform_8, window_bounds = array<i64: 1, 64>}, {pipeline_mode = #tpu.pipeline_mode<synchronous>, transform_indices = @transform_9, window_bounds = array<i64: 64, 32>}, {pipeline_mode = #tpu.pipeline_mode<synchronous>, transform_indices = @transform_10, window_bounds = array<i64: 1, 32>}, {transform_indices = @transform_11, window_bounds = array<i64: 1, 64, 128>}, {transform_indices = @transform_12, window_bounds = array<i64: 1, 64, 64>}, {transform_indices = @transform_13, window_bounds = array<i64: 1, 1, 32>}]} {
    %c0 = arith.constant 0 : index
    %c0_0 = arith.constant 0 : index
    %c0_1 = arith.constant 0 : index
    %0 = vector.load %arg1[%c0, %c0_0, %c0_1] : memref<1x64x128xbf16, #tpu.memory_space<vmem>>, vector<1x64x128xbf16>
    %1 = vector.shape_cast %0 : vector<1x64x128xbf16> to vector<64x128xbf16>
    %c0_2 = arith.constant 0 : index
    %c0_3 = arith.constant 0 : index
    %2 = vector.load %arg2[%c0_2, %c0_3] : memref<128x128xbf16, #tpu.memory_space<vmem>>, vector<128x128xbf16>
    %cst = arith.constant dense<0.000000e+00> : vector<64x128xf32>
    %3 = tpu.matmul %1, %2, %cst {dimension_numbers = #tpu.dot_dimension_numbers<[1], [0], [0], [1], [0, 0, 1, 1], [], []>} : vector<64x128xbf16>, vector<128x128xbf16>, vector<64x128xf32> -> vector<64x128xf32>
    %c0_4 = arith.constant 0 : index
    %c0_5 = arith.constant 0 : index
    %4 = vector.load %arg3[%c0_4, %c0_5] : memref<1x128xf32, #tpu.memory_space<vmem>>, vector<1x128xf32>
    %5 = vector.broadcast %4 : vector<1x128xf32> to vector<64x128xf32>
    %6 = arith.addf %3, %5 : vector<64x128xf32>
    %cst_6 = arith.constant 0.000000e+00 : f32
    %7 = vector.broadcast %cst_6 : f32 to vector<64x128xf32>
    %8 = arith.maximumf %6, %7 : vector<64x128xf32>
    %9 = arith.truncf %8 : vector<64x128xf32> to vector<64x128xbf16>
    %10 = vector.shape_cast %9 : vector<64x128xbf16> to vector<1x64x128xbf16>
    %c0_7 = arith.constant 0 : index
    %c0_8 = arith.constant 0 : index
    %c0_9 = arith.constant 0 : index
    %11 = vector.load %arg12[%c0_7, %c0_8, %c0_9] : memref<1x64x128xbf16, #tpu.memory_space<vmem>>, vector<1x64x128xbf16>
    tpu.vector_store %arg12[%c0_7, %c0_8, %c0_9], %10 {strides = array<i32>} : memref<1x64x128xbf16, #tpu.memory_space<vmem>>, vector<1x64x128xbf16>,
    %c0_10 = arith.constant 0 : index
    %c0_11 = arith.constant 0 : index
    %12 = vector.load %arg4[%c0_10, %c0_11] : memref<128x128xbf16, #tpu.memory_space<vmem>>, vector<128x128xbf16>
    %cst_12 = arith.constant dense<0.000000e+00> : vector<64x128xf32>
    %13 = tpu.matmul %9, %12, %cst_12 {dimension_numbers = #tpu.dot_dimension_numbers<[1], [0], [0], [1], [0, 0, 1, 1], [], []>} : vector<64x128xbf16>, vector<128x128xbf16>, vector<64x128xf32> -> vector<64x128xf32>
    %c0_13 = arith.constant 0 : index
    %c0_14 = arith.constant 0 : index
    %14 = vector.load %arg5[%c0_13, %c0_14] : memref<1x128xf32, #tpu.memory_space<vmem>>, vector<1x128xf32>
    %15 = vector.broadcast %14 : vector<1x128xf32> to vector<64x128xf32>
    %16 = arith.addf %13, %15 : vector<64x128xf32>
    %cst_15 = arith.constant 0.000000e+00 : f32
    %17 = vector.broadcast %cst_15 : f32 to vector<64x128xf32>
    %18 = arith.maximumf %16, %17 : vector<64x128xf32>
    %19 = arith.truncf %18 : vector<64x128xf32> to vector<64x128xbf16>
    %c0_16 = arith.constant 0 : index
    %c0_17 = arith.constant 0 : index
    %20 = vector.load %arg6[%c0_16, %c0_17] : memref<128x64xbf16, #tpu.memory_space<vmem>>, vector<128x64xbf16>
    %cst_18 = arith.constant dense<0.000000e+00> : vector<64x64xf32>
    %21 = tpu.matmul %19, %20, %cst_18 {dimension_numbers = #tpu.dot_dimension_numbers<[1], [0], [0], [1], [0, 0, 1, 1], [], []>} : vector<64x128xbf16>, vector<128x64xbf16>, vector<64x64xf32> -> vector<64x64xf32>
    %c0_19 = arith.constant 0 : index
    %c0_20 = arith.constant 0 : index
    %22 = vector.load %arg7[%c0_19, %c0_20] : memref<1x64xf32, #tpu.memory_space<vmem>>, vector<1x64xf32>
    %23 = vector.broadcast %22 : vector<1x64xf32> to vector<64x64xf32>
    %24 = arith.addf %21, %23 : vector<64x64xf32>
    %25 = arith.truncf %24 : vector<64x64xf32> to vector<64x64xbf16>
    %26 = vector.shape_cast %25 : vector<64x64xbf16> to vector<1x64x64xbf16>
    %c0_21 = arith.constant 0 : index
    %c0_22 = arith.constant 0 : index
    %c0_23 = arith.constant 0 : index
    %27 = vector.load %arg13[%c0_21, %c0_22, %c0_23] : memref<1x64x64xbf16, #tpu.memory_space<vmem>>, vector<1x64x64xbf16>
    tpu.vector_store %arg13[%c0_21, %c0_22, %c0_23], %26 {strides = array<i32>} : memref<1x64x64xbf16, #tpu.memory_space<vmem>>, vector<1x64x64xbf16>,
    %28 = vector.shape_cast %8 : vector<64x128xf32> to vector<1x64x128xf32>
    %cst_24 = arith.constant dense<0.000000e+00> : vector<1x128xf32>
    %29 = vector.multi_reduction <add>, %28, %cst_24 [1] : vector<1x64x128xf32> to vector<1x128xf32>
    %30 = arith.truncf %29 : vector<1x128xf32> to vector<1x128xbf16>
    %c0_25 = arith.constant 0 : index
    %c0_26 = arith.constant 0 : index
    %31 = vector.load %arg8[%c0_25, %c0_26] : memref<128x64xbf16, #tpu.memory_space<vmem>>, vector<128x64xbf16>
    %cst_27 = arith.constant dense<0.000000e+00> : vector<1x64xf32>
    %32 = tpu.matmul %30, %31, %cst_27 {dimension_numbers = #tpu.dot_dimension_numbers<[1], [0], [0], [1], [0, 0, 1, 1], [], []>} : vector<1x128xbf16>, vector<128x64xbf16>, vector<1x64xf32> -> vector<1x64xf32>
    %c0_28 = arith.constant 0 : index
    %c0_29 = arith.constant 0 : index
    %33 = vector.load %arg9[%c0_28, %c0_29] : memref<1x64xf32, #tpu.memory_space<vmem>>, vector<1x64xf32>
    %34 = arith.addf %32, %33 : vector<1x64xf32>
    %cst_30 = arith.constant 0.000000e+00 : f32
    %35 = vector.broadcast %cst_30 : f32 to vector<1x64xf32>
    %36 = arith.maximumf %34, %35 : vector<1x64xf32>
    %37 = arith.truncf %36 : vector<1x64xf32> to vector<1x64xbf16>
    %c0_31 = arith.constant 0 : index
    %c0_32 = arith.constant 0 : index
    %38 = vector.load %arg10[%c0_31, %c0_32] : memref<64x32xbf16, #tpu.memory_space<vmem>>, vector<64x32xbf16>
    %cst_33 = arith.constant dense<0.000000e+00> : vector<1x32xf32>
    %39 = tpu.matmul %37, %38, %cst_33 {dimension_numbers = #tpu.dot_dimension_numbers<[1], [0], [0], [1], [0, 0, 1, 1], [], []>} : vector<1x64xbf16>, vector<64x32xbf16>, vector<1x32xf32> -> vector<1x32xf32>
    %c0_34 = arith.constant 0 : index
    %c0_35 = arith.constant 0 : index
    %40 = vector.load %arg11[%c0_34, %c0_35] : memref<1x32xf32, #tpu.memory_space<vmem>>, vector<1x32xf32>
    %41 = arith.addf %39, %40 : vector<1x32xf32>
    %42 = vector.shape_cast %41 : vector<1x32xf32> to vector<1x1x32xf32>
    %c0_36 = arith.constant 0 : index
    %c0_37 = arith.constant 0 : index
    %c0_38 = arith.constant 0 : index
    %43 = vector.load %arg14[%c0_36, %c0_37, %c0_38] : memref<1x1x32xf32, #tpu.memory_space<vmem>>, vector<1x1x32xf32>
    tpu.vector_store %arg14[%c0_36, %c0_37, %c0_38], %42 {strides = array<i32>} : memref<1x1x32xf32, #tpu.memory_space<vmem>>, vector<1x1x32xf32>,
    return
  }
  func.func @transform_0(%arg0: i32) -> (i32, i32, i32) {
    %c0_i32 = arith.constant 0 : i32
    %c0_i32_0 = arith.constant 0 : i32
    %c0_i32_1 = arith.constant 0 : i32
    return %arg0, %c0_i32, %c0_i32_0 : i32, i32, i32
  }
  func.func @transform_1(%arg0: i32) -> (i32, i32) {
    %c0_i32 = arith.constant 0 : i32
    %c0_i32_0 = arith.constant 0 : i32
    %c0_i32_1 = arith.constant 0 : i32
    return %c0_i32, %c0_i32_0 : i32, i32
  }
  func.func @transform_2(%arg0: i32) -> (i32, i32) {
    %c0_i32 = arith.constant 0 : i32
    %c0_i32_0 = arith.constant 0 : i32
    %c0_i32_1 = arith.constant 0 : i32
    return %c0_i32, %c0_i32_0 : i32, i32
  }
  func.func @transform_3(%arg0: i32) -> (i32, i32) {
    %c0_i32 = arith.constant 0 : i32
    %c0_i32_0 = arith.constant 0 : i32
    %c0_i32_1 = arith.constant 0 : i32
    return %c0_i32, %c0_i32_0 : i32, i32
  }
  func.func @transform_4(%arg0: i32) -> (i32, i32) {
    %c0_i32 = arith.constant 0 : i32
    %c0_i32_0 = arith.constant 0 : i32
    %c0_i32_1 = arith.constant 0 : i32
    return %c0_i32, %c0_i32_0 : i32, i32
  }
  func.func @transform_5(%arg0: i32) -> (i32, i32) {
    %c0_i32 = arith.constant 0 : i32
    %c0_i32_0 = arith.constant 0 : i32
    %c0_i32_1 = arith.constant 0 : i32
    return %c0_i32, %c0_i32_0 : i32, i32
  }
  func.func @transform_6(%arg0: i32) -> (i32, i32) {
    %c0_i32 = arith.constant 0 : i32
    %c0_i32_0 = arith.constant 0 : i32
    %c0_i32_1 = arith.constant 0 : i32
    return %c0_i32, %c0_i32_0 : i32, i32
  }
  func.func @transform_7(%arg0: i32) -> (i32, i32) {
    %c0_i32 = arith.constant 0 : i32
    %c0_i32_0 = arith.constant 0 : i32
    %c0_i32_1 = arith.constant 0 : i32
    return %c0_i32, %c0_i32_0 : i32, i32
  }
  func.func @transform_8(%arg0: i32) -> (i32, i32) {
    %c0_i32 = arith.constant 0 : i32
    %c0_i32_0 = arith.constant 0 : i32
    %c0_i32_1 = arith.constant 0 : i32
    return %c0_i32, %c0_i32_0 : i32, i32
  }
  func.func @transform_9(%arg0: i32) -> (i32, i32) {
    %c0_i32 = arith.constant 0 : i32
    %c0_i32_0 = arith.constant 0 : i32
    %c0_i32_1 = arith.constant 0 : i32
    return %c0_i32, %c0_i32_0 : i32, i32
  }
  func.func @transform_10(%arg0: i32) -> (i32, i32) {
    %c0_i32 = arith.constant 0 : i32
    %c0_i32_0 = arith.constant 0 : i32
    %c0_i32_1 = arith.constant 0 : i32
    return %c0_i32, %c0_i32_0 : i32, i32
  }
  func.func @transform_11(%arg0: i32) -> (i32, i32, i32) {
    %c0_i32 = arith.constant 0 : i32
    %c0_i32_0 = arith.constant 0 : i32
    %c0_i32_1 = arith.constant 0 : i32
    return %arg0, %c0_i32, %c0_i32_0 : i32, i32, i32
  }
  func.func @transform_12(%arg0: i32) -> (i32, i32, i32) {
    %c0_i32 = arith.constant 0 : i32
    %c0_i32_0 = arith.constant 0 : i32
    %c0_i32_1 = arith.constant 0 : i32
    return %arg0, %c0_i32, %c0_i32_0 : i32, i32, i32
  }
  func.func @transform_13(%arg0: i32) -> (i32, i32, i32) {
    %c0_i32 = arith.constant 0 : i32
    %c0_i32_0 = arith.constant 0 : i32
    %c0_i32_1 = arith.constant 0 : i32
    return %arg0, %c0_i32, %c0_i32_0 : i32, i32, i32
  }
}

</mosaic_0001>

<bundles_post_ra>
// kernel: tile.26
= control target key start
LH: loop header
LB: loop body
LE: loop exit
PB: predicated region body
PF: predicated region fallthrough
CT: control target
= control target key end

     0   :  { %s28_s0 = inlined_call_operand.vmem [shape: f32[3], index: 0, kind: input, shape index: {}]   ;;  %s29_s1 = inlined_call_operand.vmem [shape: f32[9,3], index: 1, kind: output, shape index: {}]  }
   0x1   :  { %v4_v0 = vld [vmem:[%s28_s0] ss:$0 sm:$0xff] }
   0x2   :  { %5 = vst [vmem:[%s29_s1] sm:$0xff] %v4_v0 }
   0x3   :  { %8 = vst [vmem:[%s29_s1 + $0x8] sm:$0xff] %v4_v0 }

// kernel: mul.33
= control target key start
LH: loop header
LB: loop body
LE: loop exit
PB: predicated region body
PF: predicated region fallthrough
CT: control target
= control target key end

     0   :  { %s75_s10 = smov 24   ;;  %s76_s11 = smov 18   ;;  %vm3_vm0 = vcmask 23552   ;;  %vm9_vm1 = vcmask 220352   ;;  %vm15_vm2 = vcmask 195752   ;;  %vm21_vm3 = vcmask 171152   ;;  %s123_s0 = inlined_call_operand.vmem [shape: f32[9,3], index: 0, kind: input, shape index: {}]   ;;  %s124_s1 = inlined_call_operand.vmem [shape: f32[27], index: 1, kind: output, shape index: {}]  }
   0x1   :  { %v59_v0 = vld [vmem:[%s123_s0 + $0x8] sm:$0x1]   ;;  %v61_v1 = vld [vmem:[%s123_s0 + $0x6] sm:$0x1]   ;;  %v63_v2 = vld [vmem:[%s123_s0 + $0x4] sm:$0x1]  }
   0x2   :  { %7 = vrot.lane.b32.xlu0 %v59_v0, %s75_s10  ;;  %19 = vrot.lane.b32.xlu1 %v61_v1, %s76_s11  ;;  %s77_s14 = smov 12   ;;  %v60_v3 = vld [vmem:[%s123_s0 + $0x7] sm:$0x1]   ;;  %v62_v4 = vld [vmem:[%s123_s0 + $0x5] sm:$0x1]   ;;  %s78_s19 = smov 21  }
   0x3   :  { %31 = vrot.lane.b32.xlu2 %v63_v2, %s77_s14  ;;  %s79_s20 = smov 15   ;;  %v64_v5 = vld [vmem:[%s123_s0 + $0x3] sm:$0x1]   ;;  %s80_s23 = smov 9   ;;  %v65_v6 = vld [vmem:[%s123_s0 + $0x2] sm:$0x1]  }
   0x4   :  { %v66_v7 = vld [vmem:[%s123_s0 + $0x1] sm:$0x1]   ;;  %s81_s28 = smov 6   ;;  %s82_s29 = smov 3   ;;  %v2_v8 = vld [vmem:[%s123_s0] sm:$0x1]  }
   0x5   :  { %4 = vst.msk [vmem:[#allocation0] sm:$0x1] %vm3_vm0, %v2_v8   ;;  %vm27_vm4 = vcmask 146552   ;;  %vm33_vm5 = vcmask 121952   ;;  %vm39_vm6 = vcmask 97352   ;;  %vm45_vm7 = vcmask 72752  }
   0x6   :  { %vm51_vm8 = vcmask 48152  }
   0xa   :  { %13 = vrot.lane.b32.xlu0 %v60_v3, %s78_s19  ;;  %25 = vrot.lane.b32.xlu1 %v62_v4, %s79_s20 }
   0xb   :  { %37 = vrot.lane.b32.xlu2 %v64_v5, %s80_s23 }
  0x12   :  { %43 = vrot.lane.b32.xlu0 %v65_v6, %s81_s28  ;;  %49 = vrot.lane.b32.xlu1 %v66_v7, %s82_s29 }
  0x5d   :  { %v32_v9 = vpop.permute.xlu2 %31  }
  0x65   :  { %v38_v10 = vpop.permute.xlu2 %37  }
  0x74   :  { %v8_v11 = vpop.permute.xlu0 %7   ;;  %v20_v12 = vpop.permute.xlu1 %19  }
  0x75   :  { %10 = vst.msk [vmem:[#allocation0] sm:$0x1] %vm9_vm1, %v8_v11  }
  0x7c   :  { %v14_v13 = vpop.permute.xlu0 %13   ;;  %v26_v14 = vpop.permute.xlu1 %25  }
  0x7d   :  { %16 = vst.msk [vmem:[#allocation0] sm:$0x1] %vm15_vm2, %v14_v13  }
  0x7e   :  { %22 = vst.msk [vmem:[#allocation0] sm:$0x1] %vm21_vm3, %v20_v12  }
  0x7f   :  { %28 = vst.msk [vmem:[#allocation0] sm:$0x1] %vm27_vm4, %v26_v14  }
  0x80   :  { %34 = vst.msk [vmem:[#allocation0] sm:$0x1] %vm33_vm5, %v32_v9  }
  0x81   :  { %40 = vst.msk [vmem:[#allocation0] sm:$0x1] %vm39_vm6, %v38_v10  }
  0x84   :  { %v44_v15 = vpop.permute.xlu0 %43   ;;  %v50_v16 = vpop.permute.xlu1 %49  }
  0x85   :  { %46 = vst.msk [vmem:[#allocation0] sm:$0x1] %vm45_vm7, %v44_v15  }
  0x86   :  { %52 = vst.msk [vmem:[#allocation0] sm:$0x1] %vm51_vm8, %v50_v16  }
  0x8d   :  { %v55_v17 = vld [vmem:[#allocation0] sm:$0x1] }
  0x8e   :  { %58 = vst [vmem:[%s124_s1] sm:$0x1] %v55_v17 }

// kernel: tile.41
= control target key start
LH: loop header
LB: loop body
LE: loop exit
PB: predicated region body
PF: predicated region fallthrough
CT: control target
= control target key end

     0   :  { %s22_s0 = inlined_call_operand.vmem [shape: f32[16], index: 0, kind: input, shape index: {}]   ;;  %s23_s1 = inlined_call_operand.vmem [shape: f32[4,16], index: 1, kind: output, shape index: {}]  }
   0x1   :  { %v4_v0 = vld [vmem:[%s22_s0] ss:$0 sm:$0xff] }
   0x2   :  { %5 = vst [vmem:[%s23_s1] sm:$0xf] %v4_v0 }

// kernel: tile.42
= control target key start
LH: loop header
LB: loop body
LE: loop exit
PB: predicated region body
PF: predicated region fallthrough
CT: control target
= control target key end

     0   :  { %s37_s8 = smov 16   ;;  %s38_s9 = smov 32   ;;  %vm7_vm0 = vcmask 130048   ;;  %vm13_vm1 = vcmask 523648   ;;  %vm19_vm2 = vcmask 392448   ;;  %vm25_vm3 = vcmask 261248   ;;  %s55_s0 = inlined_call_operand.vmem [shape: f32[4,16], index: 0, kind: input, shape index: {}]   ;;  %s56_s1 = inlined_call_operand.vmem [shape: f32[1,64], index: 1, kind: output, shape index: {}]  }
   0x1   :  { %v4_v0 = vld [vmem:[%s55_s0] sm:$0xf]  ;;  %s36_s0 = smov 48  }
   0x2   :  { %5 = vst [vmem:[#allocation1] sm:$0xf] %v4_v0 }
   0x9   :  { %v10_v1 = vld [vmem:[#allocation1 + $0x3] sm:$0x1]   ;;  %v22_v2 = vld [vmem:[#allocation1 + $0x1] sm:$0x1]   ;;  %v16_v3 = vld [vmem:[#allocation1 + $0x2] sm:$0x1]  }
   0xa   :  { %11 = vrot.lane.b32.xlu0 %v10_v1, %s36_s0  ;;  %23 = vrot.lane.b32.xlu1 %v22_v2, %s37_s8  ;;  %v6_v4 = vld [vmem:[#allocation1] sm:$0x1]  }
   0xb   :  { %8 = vst.msk [vmem:[#allocation0] sm:$0x1] %vm7_vm0, %v6_v4  }
  0x12   :  { %17 = vrot.lane.b32.xlu0 %v16_v3, %s38_s9 }
  0x7c   :  { %v12_v5 = vpop.permute.xlu0 %11   ;;  %v24_v6 = vpop.permute.xlu1 %23  }
  0x7d   :  { %14 = vst.msk [vmem:[#allocation0] sm:$0x1] %vm13_vm1, %v12_v5  }
  0x84   :  { %v18_v7 = vpop.permute.xlu0 %17  }
  0x85   :  { %20 = vst.msk [vmem:[#allocation0] sm:$0x1] %vm19_vm2, %v18_v7  }
  0x86   :  { %26 = vst.msk [vmem:[#allocation0] sm:$0x1] %vm25_vm3, %v24_v6  }
  0x8d   :  { %v29_v8 = vld [vmem:[#allocation0] sm:$0x1] }
  0x8e   :  { %32 = vst [vmem:[%s56_s1] sm:$0x1] %v29_v8 }

// kernel: tile.31
= control target key start
LH: loop header
LB: loop body
LE: loop exit
PB: predicated region body
PF: predicated region fallthrough
CT: control target
= control target key end

     0   :  { %s22_s0 = inlined_call_operand.vmem [shape: f32[32], index: 0, kind: input, shape index: {}]   ;;  %s23_s1 = inlined_call_operand.vmem [shape: f32[4,32], index: 1, kind: output, shape index: {}]  }
   0x1   :  { %v4_v0 = vld [vmem:[%s22_s0] ss:$0 sm:$0xff] }
   0x2   :  { %5 = vst [vmem:[%s23_s1] sm:$0xf] %v4_v0 }

// kernel: tile.32
= control target key start
LH: loop header
LB: loop body
LE: loop exit
PB: predicated region body
PF: predicated region fallthrough
CT: control target
= control target key end

     0   :  { %s37_s8 = smov 32   ;;  %s38_s9 = smov 64   ;;  %vm7_vm0 = vcmask 261120   ;;  %vm13_vm1 = vcmask 1048320   ;;  %vm19_vm2 = vcmask 785920   ;;  %vm25_vm3 = vcmask 523520   ;;  %s55_s0 = inlined_call_operand.vmem [shape: f32[4,32], index: 0, kind: input, shape index: {}]   ;;  %s56_s1 = inlined_call_operand.vmem [shape: f32[1,128], index: 1, kind: output, shape index: {}]  }
   0x1   :  { %v4_v0 = vld [vmem:[%s55_s0] sm:$0xf]  ;;  %s36_s0 = smov 96  }
   0x2   :  { %5 = vst [vmem:[#allocation1] sm:$0xf] %v4_v0 }
   0x9   :  { %v10_v1 = vld [vmem:[#allocation1 + $0x3] sm:$0x1]   ;;  %v22_v2 = vld [vmem:[#allocation1 + $0x1] sm:$0x1]   ;;  %v16_v3 = vld [vmem:[#allocation1 + $0x2] sm:$0x1]  }
   0xa   :  { %11 = vrot.lane.b32.xlu0 %v10_v1, %s36_s0  ;;  %23 = vrot.lane.b32.xlu1 %v22_v2, %s37_s8  ;;  %v6_v4 = vld [vmem:[#allocation1] sm:$0x1]  }
   0xb   :  { %8 = vst.msk [vmem:[#allocation0] sm:$0x1] %vm7_vm0, %v6_v4  }
  0x12   :  { %17 = vrot.lane.b32.xlu0 %v16_v3, %s38_s9 }
  0x7c   :  { %v12_v5 = vpop.permute.xlu0 %11   ;;  %v24_v6 = vpop.permute.xlu1 %23  }
  0x7d   :  { %14 = vst.msk [vmem:[#allocation0] sm:$0x1] %vm13_vm1, %v12_v5  }
  0x84   :  { %v18_v7 = vpop.permute.xlu0 %17  }
  0x85   :  { %20 = vst.msk [vmem:[#allocation0] sm:$0x1] %vm19_vm2, %v18_v7  }
  0x86   :  { %26 = vst.msk [vmem:[#allocation0] sm:$0x1] %vm25_vm3, %v24_v6  }
  0x8d   :  { %v29_v8 = vld [vmem:[#allocation0] sm:$0x1] }
  0x8e   :  { %32 = vst [vmem:[%s56_s1] sm:$0x1] %v29_v8 }

// kernel: faster_rcnn_forward.1
= control target key start
LH: loop header
LB: loop body
LE: loop exit
PB: predicated region body
PF: predicated region fallthrough
CT: control target
= control target key end

     0   :  { %s1451_s25 = smov 0   ;;  %s1640_s0 = inlined_call_operand.vmem [shape: bf16[2,64,128], index: 0, kind: input, shape index: {}]   ;;  %s1641_s1 = inlined_call_operand.vmem [shape: bf16[128,128], index: 1, kind: input, shape index: {}]   ;;  %s1642_s2 = inlined_call_operand.vmem [shape: f32[1,128], index: 2, kind: input, shape index: {}]   ;;  %s1643_s3 = inlined_call_operand.vmem [shape: bf16[128,128], index: 3, kind: input, shape index: {}]   ;;  %s1644_s4 = inlined_call_operand.vmem [shape: f32[1,128], index: 4, kind: input, shape index: {}]   ;;  %s1645_s5 = inlined_call_operand.vmem [shape: bf16[128,64], index: 5, kind: input, shape index: {}]   ;;  %s1646_s6 = inlined_call_operand.vmem [shape: f32[1,64], index: 6, kind: input, shape index: {}]   ;;  %s1647_s7 = inlined_call_operand.vmem [shape: bf16[128,64], index: 7, kind: input, shape index: {}]   ;;  %s1648_s8 = inlined_call_operand.vmem [shape: f32[1,64], index: 8, kind: input, shape index: {}]   ;;  %s1649_s9 = inlined_call_operand.vmem [shape: bf16[64,32], index: 9, kind: input, shape index: {}]   ;;  %s1650_s10 = inlined_call_operand.vmem [shape: f32[1,32], index: 10, kind: input, shape index: {}]   ;;  %s1651_s11 = inlined_call_operand.vmem [shape: bf16[2,64,128], index: 11, kind: output, shape index: {0}]   ;;  %s1652_s12 = inlined_call_operand.vmem [shape: bf16[2,64,64], index: 12, kind: output, shape index: {1}]   ;;  %s1653_s13 = inlined_call_operand.vmem [shape: f32[2,1,32], index: 13, kind: output, shape index: {2}]  }
   0x1 LB: > { %s1122_s26 = sadd.s32 4294967295, %s1379_s25   ;;  %p1126_p0 = scmp.ge.s32.totalorder %s1379_s25, 1  ;;  %s1379_s25 = sphi %s1451_s25, %s24_s25  }
   0x2   : > { %p392_p1 = scmp.lt.s32.totalorder %s1379_s25, 3 }
   0x4   : > { %p393_p2 = pnand %p1126_p0, %p392_p1 }
   0x5   : > { %p444_p3 = scmp.lt.s32.totalorder (!%p393_p2), %s1122_s26, 1 }
   0x6   : > { %396 = sbr.rel (%p393_p2) target bundleno = 523 (0x20b), region = 64 }
   0xb   : > { %v1310_v0 = vld [vmem:[%s1641_s1 + $0x38] sm:$0xff]  ;;  %v1309_v1 = vld [vmem:[%s1641_s1 + $0x30] sm:$0xff]  ;;  %v1308_v2 = vld [vmem:[%s1641_s1 + $0x28] sm:$0xff]  ;;  %s1655_s26 = smov (!%p444_p3, %s1122_s26), 1  ;;  %vm990_vm0 = vcmask 523264   ;;  %vm854_vm1 = vcmask 519168  }
   0xc   : > { %563 = vmatpush.bf16.msra.mxu0 %v1310_v0  ;;  %v1307_v3 = vld [vmem:[%s1641_s1 + $0x20] sm:$0xff]  ;;  %v1306_v4 = vld [vmem:[%s1641_s1 + $0x18] sm:$0xff]  ;;  %v1305_v5 = vld [vmem:[%s1641_s1 + $0x10] sm:$0xff]  ;;  %s1483_s24 = sshll.u32 %s1655_s26, 5  ;;  %s461_s19 = scalar_lea.vmem %s1653_s13, %s1655_s26  ;;  %vm1007_vm2 = vcmask 253952  }
   0xd   : > { %v1304_v6 = vld [vmem:[%s1641_s1 + $0x8] sm:$0xff]  ;;  %v1303_v7 = vld [vmem:[%s1641_s1] sm:$0xff]  ;;  %s448_s14 = scalar_lea.vmem %s1640_s0, %s1483_s24  ;;  %v1318_v10 = vld [vmem:[%s1643_s3 + $0x38] sm:$0xff]  ;;  %s1527_s21 = scalar_lea.vmem %s1651_s11, %s1483_s24 }
   0xe   : > { %v1299_v8 = vld [vmem:[%s448_s14] sm:$0xff]  ;;  %v1300_v9 = vld [vmem:[%s448_s14 + $0x8] sm:$0xff]  ;;  %708 = vmatpush.bf16.msra.mxu1 %v1318_v10  ;;  %v1317_v11 = vld [vmem:[%s1643_s3 + $0x30] sm:$0xff] }
   0xf   : > { %v1316_v12 = vld [vmem:[%s1643_s3 + $0x28] sm:$0xff]  ;;  %v1301_v13 = vld [vmem:[%s448_s14 + $0x10] sm:$0xff]  ;;  %v1302_v14 = vld [vmem:[%s448_s14 + $0x18] sm:$0xff]  ;;  %s1612_s14 = scalar_lea.vmem %s1652_s12, %s1483_s24 }
  0x10   : > { %564 = vmatpush.bf16.msra.mxu0 %v1309_v1  ;;  %v1315_v15 = vld [vmem:[%s1643_s3 + $0x20] sm:$0xff]  ;;  %v1314_v16 = vld [vmem:[%s1643_s3 + $0x18] sm:$0xff]  ;;  %v1313_v17 = vld [vmem:[%s1643_s3 + $0x10] sm:$0xff] }
  0x11   : > { %v1312_v18 = vld [vmem:[%s1643_s3 + $0x8] sm:$0xff]  ;;  %v1311_v19 = vld [vmem:[%s1643_s3] sm:$0xff]  ;;  %v1334_v28 = vld [vmem:[%s1647_s7 + $0x38] sm:$0xff] }
  0x12   : > { %709 = vmatpush.bf16.msra.mxu1 %v1317_v11  ;;  %v1519_v20 = vld [vmem:[%s1642_s2] ss:$0 sm:$0xff]  ;;  %942 = vmatpush.bf16.msra.mxu3 %v1334_v28  ;;  %v1333_v34 = vld [vmem:[%s1647_s7 + $0x30] sm:$0xff]  ;;  %v1332_v37 = vld [vmem:[%s1647_s7 + $0x28] sm:$0xff] }
  0x13   : > { %v1331_v40 = vld [vmem:[%s1647_s7 + $0x20] sm:$0xff]  ;;  %v1330_v44 = vld [vmem:[%s1647_s7 + $0x18] sm:$0xff]  ;;  %v1329_v49 = vld [vmem:[%s1647_s7 + $0x10] sm:$0xff] }
  0x14   : > { %565 = vmatpush.bf16.msra.mxu0 %v1308_v2  ;;  %v1328_v53 = vld [vmem:[%s1647_s7 + $0x8] sm:$0xff]  ;;  %v1327_v54 = vld [vmem:[%s1647_s7] sm:$0xff]  ;;  %v1326_v62 = vld [vmem:[%s1645_s5 + $0x38] sm:$0xff] }
  0x15   : > { %817 = vmatpush.bf16.msra.mxu2 %v1326_v62  ;;  %v1325_v1 = vld [vmem:[%s1645_s5 + $0x30] sm:$0xff]  ;;  %v1323_v11 = vld [vmem:[%s1645_s5 + $0x20] sm:$0xff] }
  0x16   : > { %710 = vmatpush.bf16.msra.mxu1 %v1316_v12  ;;  %943 = vmatpush.bf16.msra.mxu3 %v1333_v34  ;;  %v1319_v34 = vld [vmem:[%s1645_s5] sm:$0xff] }
  0x18   : > { %566 = vmatpush.bf16.msra.mxu0 %v1307_v3 }
  0x19   : > { %818 = vmatpush.bf16.msra.mxu2 %v1325_v1 }
  0x1a   : > { %711 = vmatpush.bf16.msra.mxu1 %v1315_v15  ;;  %944 = vmatpush.bf16.msra.mxu3 %v1332_v37 }
  0x1c   : > { %567 = vmatpush.bf16.msra.mxu0 %v1306_v4 }
  0x1e   : > { %712 = vmatpush.bf16.msra.mxu1 %v1314_v16  ;;  %945 = vmatpush.bf16.msra.mxu3 %v1331_v40 }
  0x20   : > { %568 = vmatpush.bf16.msra.mxu0 %v1305_v5 }
  0x22   : > { %713 = vmatpush.bf16.msra.mxu1 %v1313_v17  ;;  %946 = vmatpush.bf16.msra.mxu3 %v1330_v44  ;;  %v1338_v44 = vld [vmem:[%s1649_s9 + $0x18] sm:$0xff] }
  0x24   : > { %569 = vmatpush.bf16.msra.mxu0 %v1304_v6 }
  0x26   : > { %714 = vmatpush.bf16.msra.mxu1 %v1312_v18  ;;  %947 = vmatpush.bf16.msra.mxu3 %v1329_v49 }
  0x28   : > { %570 = vmatpush.bf16.msra.mxu0 %v1303_v7  ;;  %v1324_v7 = vld [vmem:[%s1645_s5 + $0x28] sm:$0xff] }
  0x29   : > { %819 = vmatpush.bf16.msra.mxu2 %v1324_v7 }
  0x2a   : > { %715 = vmatpush.bf16.msra.mxu1 %v1311_v19  ;;  %948 = vmatpush.bf16.msra.mxu3 %v1328_v53 }
  0x2b   : > { %571 = vmatmul.bf16.vlgmr.msra.gmra.mxu0 %v1299_v8 }
  0x2d   : > { %820 = vmatpush.bf16.msra.mxu2 %v1323_v11 }
  0x2e   : > { %949 = vmatpush.bf16.msra.mxu3 %v1327_v54  ;;  %v1335_v54 = vld [vmem:[%s1649_s9] sm:$0xff] }
  0x32   : > { %998 = vmatpush.bf16.msrb.mxu3 %v1338_v44 }
  0x3b   : > { %576 = vmatmul.bf16.gmra.mxu0 %v1300_v9 }
  0x4b   : > { %581 = vmatmul.bf16.gmra.mxu0 %v1301_v13 }
  0x5b   : > { %586 = vmatmul.bf16.gmra.mxu0 %v1302_v14 }
  0xa8   : > { %v572_v21 = vpop.f32.mrf.mxu0 }
  0xa9   : > { %v573_v22 = vadd.f32 %v1519_v20, %v572_v21 }
  0xab   : > { %v592_v23 = vmax.f32 %v573_v22, 0.0 }
  0xad   : > { %v600_v27 = vpack.c.bf16 %v592_v23, %v592_v23 }
  0xaf   : > { %v644_v31 = vunpack.c.l.b16 %v600_v27 }
  0xb0   : > { %v574_v24 = vpop.f32.mrf.mxu0 }
  0xb1   : > { %v575_v25 = vadd.f32 %v1519_v20, %v574_v24 }
  0xb3   : > { %v593_v26 = vmax.f32 %v575_v25, 0.0 }
  0xb5   : > { %v1342_v29 = vpack.c.bf16 %v593_v26, %v592_v23  ;;  %v601_v30 = vpack.c.bf16 %v593_v26, %v593_v26  ;;  %v863_v3 = vadd.f32 %v593_v26, %v592_v23 }
  0xb7   : > { %1343 = vst [vmem:[%s1527_s21] sm:$0xff] %v1342_v29   ;;  %v645_v32 = vunpack.c.l.b16 %v601_v30 }
  0xb8   : > { %v577_v33 = vpop.f32.mrf.mxu0 }
  0xb9   : > { %v652_v35 = vpack.c.b16 %v645_v32, %v644_v31  ;;  %v578_v36 = vadd.f32 %v1519_v20, %v577_v33  ;;  %v1321_v32 = vld [vmem:[%s1645_s5 + $0x10] sm:$0xff]  ;;  %v1320_v33 = vld [vmem:[%s1645_s5 + $0x8] sm:$0xff] }
  0xbb   : > { %716 = vmatmul.bf16.vlgmr.msra.gmra.mxu1 %v652_v35  ;;  %v594_v38 = vmax.f32 %v578_v36, 0.0  ;;  %v1371_v36 = vld [vmem:[%s1644_s4] ss:$0 sm:$0xff] }
  0xbd   : > { %v602_v43 = vpack.c.bf16 %v594_v38, %v594_v38  ;;  %v864_v5 = vadd.f32 %v863_v3, %v594_v38 }
  0xbf   : > { %v646_v47 = vunpack.c.l.b16 %v602_v43 }
  0xc0   : > { %v579_v39 = vpop.f32.mrf.mxu0 }
  0xc1   : > { %v580_v41 = vadd.f32 %v1519_v20, %v579_v39 }
  0xc3   : > { %v595_v42 = vmax.f32 %v580_v41, 0.0 }
  0xc5   : > { %v1347_v45 = vpack.c.bf16 %v595_v42, %v594_v38  ;;  %v603_v46 = vpack.c.bf16 %v595_v42, %v595_v42  ;;  %v865_v8 = vadd.f32 %v864_v5, %v595_v42 }
  0xc7   : > { %1359 = vst [vmem:[%s1527_s21 + $0x8] sm:$0xff] %v1347_v45   ;;  %v647_v48 = vunpack.c.l.b16 %v603_v46 }
  0xc8   : > { %v582_v50 = vpop.f32.mrf.mxu0 }
  0xc9   : > { %v653_v51 = vpack.c.b16 %v647_v48, %v646_v47  ;;  %v583_v52 = vadd.f32 %v1519_v20, %v582_v50  ;;  %v1337_v48 = vld [vmem:[%s1649_s9 + $0x10] sm:$0xff] }
  0xca   : > { %999 = vmatpush.bf16.msrb.mxu3 %v1337_v48 }
  0xcb   : > { %721 = vmatmul.bf16.gmra.mxu1 %v653_v51  ;;  %v596_v55 = vmax.f32 %v583_v52, 0.0  ;;  %v1336_v52 = vld [vmem:[%s1649_s9 + $0x8] sm:$0xff] }
  0xcd   : > { %v604_v59 = vpack.c.bf16 %v596_v55, %v596_v55  ;;  %v866_v9 = vadd.f32 %v865_v8, %v596_v55 }
  0xce   : > { %1000 = vmatpush.bf16.msrb.mxu3 %v1336_v52 }
  0xcf   : > { %v648_v63 = vunpack.c.l.b16 %v604_v59 }
  0xd0   : > { %v584_v56 = vpop.f32.mrf.mxu0 }
  0xd1   : > { %v585_v57 = vadd.f32 %v1519_v20, %v584_v56 }
  0xd2   : > { %1001 = vmatpush.bf16.msrb.mxu3 %v1335_v54 }
  0xd3   : > { %v597_v58 = vmax.f32 %v585_v57, 0.0 }
  0xd5   : > { %v1352_v60 = vpack.c.bf16 %v597_v58, %v596_v55  ;;  %v605_v61 = vpack.c.bf16 %v597_v58, %v597_v58  ;;  %v867_v13 = vadd.f32 %v866_v9, %v597_v58 }
  0xd7   : > { %1360 = vst [vmem:[%s1527_s21 + $0x10] sm:$0xff] %v1352_v60   ;;  %v649_v0 = vunpack.c.l.b16 %v605_v61 }
  0xd8   : > { %v587_v2 = vpop.f32.mrf.mxu0 }
  0xd9   : > { %v654_v4 = vpack.c.b16 %v649_v0, %v648_v63  ;;  %v588_v6 = vadd.f32 %v1519_v20, %v587_v2 }
  0xdb   : > { %726 = vmatmul.bf16.gmra.mxu1 %v654_v4  ;;  %v598_v10 = vmax.f32 %v588_v6, 0.0  ;;  %v893_v4 = vld [vmem:[%s1648_s8] sm:$0x1] }
  0xdd   : > { %v868_v15 = vadd.f32 %v867_v13, %v598_v10  ;;  %v606_v17 = vpack.c.bf16 %v598_v10, %v598_v10 }
  0xdf   : > { %v650_v23 = vunpack.c.l.b16 %v606_v17 }
  0xe0   : > { %v589_v12 = vpop.f32.mrf.mxu0 }
  0xe1   : > { %v590_v14 = vadd.f32 %v1519_v20, %v589_v12  ;;  %v1322_v20 = vld [vmem:[%s1645_s5 + $0x18] sm:$0xff] }
  0xe2   : > { %821 = vmatpush.bf16.msra.mxu2 %v1322_v20 }
  0xe3   : > { %v599_v16 = vmax.f32 %v590_v14, 0.0 }
  0xe5   : > { %v1357_v18 = vpack.c.bf16 %v599_v16, %v598_v10  ;;  %v869_v19 = vadd.f32 %v868_v15, %v599_v16  ;;  %v607_v21 = vpack.c.bf16 %v599_v16, %v599_v16  ;;  %v1372_v10 = vld [vmem:[%s1646_s6] ss:$0 sm:$0xff] }
  0xe6   : > { %822 = vmatpush.bf16.msra.mxu2 %v1321_v32  ;;  %v965_v32 = vld [vmem:[%s1650_s10] sm:$0x1] }
  0xe7   : > { %1361 = vst [vmem:[%s1527_s21 + $0x18] sm:$0xff] %v1357_v18   ;;  %v870_v22 = vrot.slane %v869_v19, 4  ;;  %v651_v24 = vunpack.c.l.b16 %v607_v21 }
  0xe9   : > { %v655_v25 = vpack.c.b16 %v651_v24, %v650_v23  ;;  %v871_v26 = vadd.f32 %v870_v22, %v869_v19 }
  0xea   : > { %823 = vmatpush.bf16.msra.mxu2 %v1320_v33 }
  0xeb   : > { %731 = vmatmul.bf16.gmra.mxu1 %v655_v25  ;;  %v872_v27 = vrot.slane %v871_v26, 2 }
  0xed   : > { %v873_v28 = vadd.f32 %v872_v27, %v871_v26 }
  0xee   : > { %824 = vmatpush.bf16.msra.mxu2 %v1319_v34 }
  0xef   : > { %v874_v29 = vrot.slane %v873_v28, 1 }
  0xf1   : > { %v875_v30 = vadd.f32 %v874_v29, %v873_v28 }
  0xf3   : > { %v876_v31 = vpack.c.bf16 %v875_v30, %v875_v30 }
  0xf5   : > { %950 = vmatmul.bf16.vlgmr.msra.gmra.mxu3 %v876_v31 }
 0x138   : > { %v717_v35 = vpop.f32.mrf.mxu1 }
 0x139   : > { %v718_v37 = vadd.f32 %v1371_v36, %v717_v35 }
 0x13b   : > { %v737_v40 = vmax.f32 %v718_v37, 0.0 }
 0x140   : > { %v719_v38 = vpop.f32.mrf.mxu1 }
 0x141   : > { %v720_v39 = vadd.f32 %v1371_v36, %v719_v38 }
 0x143   : > { %v738_v41 = vmax.f32 %v720_v39, 0.0 }
 0x145   : > { %v745_v42 = vpack.c.bf16 %v738_v41, %v737_v40 }
 0x147   : > { %825 = vmatmul.bf16.vlgmr.msra.gmra.mxu2 %v745_v42 }
 0x148   : > { %v722_v43 = vpop.f32.mrf.mxu1 }
 0x149   : > { %v723_v45 = vadd.f32 %v1371_v36, %v722_v43 }
 0x14b   : > { %v739_v49 = vmax.f32 %v723_v45, 0.0 }
 0x150   : > { %v724_v46 = vpop.f32.mrf.mxu1 }
 0x151   : > { %v725_v47 = vadd.f32 %v1371_v36, %v724_v46 }
 0x153   : > { %v740_v50 = vmax.f32 %v725_v47, 0.0 }
 0x155   : > { %v746_v51 = vpack.c.bf16 %v740_v50, %v739_v49 }
 0x157   : > { %830 = vmatmul.bf16.gmra.mxu2 %v746_v51 }
 0x158   : > { %v727_v53 = vpop.f32.mrf.mxu1 }
 0x159   : > { %v728_v55 = vadd.f32 %v1371_v36, %v727_v53 }
 0x15b   : > { %v741_v58 = vmax.f32 %v728_v55, 0.0 }
 0x160   : > { %v729_v56 = vpop.f32.mrf.mxu1 }
 0x161   : > { %v730_v57 = vadd.f32 %v1371_v36, %v729_v56 }
 0x163   : > { %v742_v59 = vmax.f32 %v730_v57, 0.0 }
 0x165   : > { %v747_v60 = vpack.c.bf16 %v742_v59, %v741_v58 }
 0x167   : > { %835 = vmatmul.bf16.gmra.mxu2 %v747_v60 }
 0x168   : > { %v732_v61 = vpop.f32.mrf.mxu1 }
 0x169   : > { %v733_v62 = vadd.f32 %v1371_v36, %v732_v61 }
 0x16b   : > { %v743_v1 = vmax.f32 %v733_v62, 0.0 }
 0x170   : > { %v734_v63 = vpop.f32.mrf.mxu1 }
 0x171   : > { %v735_v0 = vadd.f32 %v1371_v36, %v734_v63 }
 0x173   : > { %v744_v2 = vmax.f32 %v735_v0, 0.0 }
 0x175   : > { %v748_v3 = vpack.c.bf16 %v744_v2, %v743_v1 }
 0x177   : > { %840 = vmatmul.bf16.gmra.mxu2 %v748_v3 }
 0x178   : > { %v951_v5 = vpop.f32.mrf.mxu3 }
 0x179   : > { %v952_v6 = vadd.f32 %v951_v5, %v893_v4 }
 0x17b   : > { %v955_v7 = vmax.f32 %v952_v6, 0.0 }
 0x17d   : > { %v956_v8 = vpack.c.bf16 %v955_v7, %v955_v7 }
 0x17f   : > { %1293 = vmatmul.msk.bf16.vlgmr.msrb.gmra.mxu3 %vm990_vm0, %v956_v8 }
 0x180   : > { %v953_v9 = vpop.f32.mrf.mxu3 }
 0x1ca   : > { %v826_v11 = vpop.f32.mrf.mxu2 }
 0x1cb   : > { %v827_v12 = vadd.f32 %v1372_v10, %v826_v11 }
 0x1cd   : > { %v846_v13 = vpack.c.bf16 %v827_v12, %v827_v12 }
 0x1cf   : > { %855 = vst.msk [vmem:[%s1612_s14] sm:$0xf] %vm854_vm1, %v846_v13 }
 0x1d2   : > { %v828_v14 = vpop.f32.mrf.mxu2 }
 0x1d3   : > { %v829_v15 = vadd.f32 %v1372_v10, %v828_v14 }
 0x1d5   : > { %v847_v16 = vpack.c.bf16 %v829_v15, %v829_v15 }
 0x1d7   : > { %856 = vst.msk [vmem:[%s1612_s14 + $0x4] sm:$0xf] %vm854_vm1, %v847_v16 }
 0x1da   : > { %v831_v17 = vpop.f32.mrf.mxu2 }
 0x1db   : > { %v832_v18 = vadd.f32 %v1372_v10, %v831_v17 }
 0x1dd   : > { %v848_v19 = vpack.c.bf16 %v832_v18, %v832_v18 }
 0x1df   : > { %857 = vst.msk [vmem:[%s1612_s14 + $0x8] sm:$0xf] %vm854_vm1, %v848_v19 }
 0x1e2   : > { %v833_v21 = vpop.f32.mrf.mxu2 }
 0x1e3   : > { %v834_v22 = vadd.f32 %v1372_v10, %v833_v21 }
 0x1e5   : > { %v849_v23 = vpack.c.bf16 %v834_v22, %v834_v22 }
 0x1e7   : > { %858 = vst.msk [vmem:[%s1612_s14 + $0xc] sm:$0xf] %vm854_vm1, %v849_v23 }
 0x1ea   : > { %v836_v24 = vpop.f32.mrf.mxu2 }
 0x1eb   : > { %v837_v25 = vadd.f32 %v1372_v10, %v836_v24 }
 0x1ed   : > { %v850_v26 = vpack.c.bf16 %v837_v25, %v837_v25 }
 0x1ef   : > { %859 = vst.msk [vmem:[%s1612_s14 + $0x10] sm:$0xf] %vm854_vm1, %v850_v26 }
 0x1f2   : > { %v838_v27 = vpop.f32.mrf.mxu2 }
 0x1f3   : > { %v839_v28 = vadd.f32 %v1372_v10, %v838_v27 }
 0x1f5   : > { %v851_v29 = vpack.c.bf16 %v839_v28, %v839_v28 }
 0x1f7   : > { %860 = vst.msk [vmem:[%s1612_s14 + $0x14] sm:$0xf] %vm854_vm1, %v851_v29 }
 0x1fa   : > { %v841_v30 = vpop.f32.mrf.mxu2 }
 0x1fb   : > { %v842_v31 = vadd.f32 %v1372_v10, %v841_v30 }
 0x1fd   : > { %v852_v20 = vpack.c.bf16 %v842_v31, %v842_v31 }
 0x1ff   : > { %861 = vst.msk [vmem:[%s1612_s14 + $0x18] sm:$0xf] %vm854_vm1, %v852_v20 }
 0x202   : > { %v843_v33 = vpop.f32.mrf.mxu2  ;;  %v1003_v34 = vpop.f32.mrf.mxu3 }
 0x203   : > { %v844_v35 = vadd.f32 %v1372_v10, %v843_v33  ;;  %v1004_v36 = vadd.f32 %v1003_v34, %v965_v32 }
 0x205   : > { %v853_v37 = vpack.c.bf16 %v844_v35, %v844_v35  ;;  %1008 = vst.msk [vmem:[%s461_s19] sm:$0x1] %vm1007_vm2, %v1004_v36 }
 0x207   : > { %862 = vst.msk [vmem:[%s1612_s14 + $0x1c] sm:$0xf] %vm854_vm1, %v853_v37 }
 0x20a   : > { %v1005_v38 = vpop.f32.mrf.mxu3 }
 0x20b PF: > { %s24_s25 = sadd.s32 1, %s1379_s25  }
 0x20c   : > { %p21_p4 = scmp.ge.s32.totalorder %s24_s25, 4  }
 0x20e   :  { %23 = sbr.rel (!%p21_p4) target bundleno = 1 (0x1), region = 118 }

</bundles_post_ra>
